<compile_context>
chip_gen: v6e
topology: v6e:2x2x1
jax: 0.10.0
libtpu: 0.0.40
codegen_flags: <defaults>
</compile_context>

<pallas_src>
import functools

import jax
import jax.numpy as jnp
from jax.experimental import pallas as pl
from jax.experimental.pallas import tpu as pltpu

N_HIDDEN = 64


def _round_up(x, m):
    return (x + m - 1) // m * m


def _baseline_kernel(x_ref, w1_ref, b1_ref, w2_ref, b2_ref, o_ref):
    """One batch tile; the batch lives on the lane axis of h and the output.

    x_ref  : (TILE_B, n_in)   x dtype (f32, or bf16 on the production path)
    w1_ref : (N_HIDDEN, n_in) x dtype             (PyTorch fc1.weight layout)
    b1_ref : (N_HIDDEN, 1)    epilogue dtype
    w2_ref : (N_HIDDEN, 1)    epilogue dtype      (fc2.weight as a column)
    b2_ref : (1, 1)           f32 in SMEM
    o_ref  : (1, TILE_B)      f32                 (lane-dense output slab)
    """
    # fc1 on the MXU as w1 . x^T (contract both operands on n_in), f32
    # accumulate -> (N_HIDDEN, TILE_B) with the batch on lanes.  This fuses
    # the old wrapper-side transpose of x into the kernel.
    h = jax.lax.dot_general(
        w1_ref[...], x_ref[...],
        dimension_numbers=(((1,), (1,)), ((), ())),
        preferred_element_type=jnp.float32)
    # Bias + ReLU (+ the fc2 weight multiply) on the VPU in the epilogue
    # dtype: f32 (v5e-safe default) or bf16 on v6e/v7x (bf16 VALUs).
    h = jnp.maximum(h.astype(b1_ref.dtype) + b1_ref[...], 0)
    # fc2 (output width 1): VPU multiply + sublane reduction with f32
    # accumulation instead of a 1-lane MXU matmul; naturally lane-dense.
    out = jnp.sum(h * w2_ref[...], axis=0, dtype=jnp.float32, keepdims=True)
    o_ref[...] = (out + b2_ref[0, 0]).astype(o_ref.dtype)


def _pick_tile(batch, max_tile_b):
    """Batch tile: multiple of 128, <= max_tile_b, no over-padding of tiny
    batches, and (when the batch allows it) an even number >= 2 of grid steps
    so v7x's two TensorCores both get work on the "parallel" axis."""
    tile = min(max_tile_b, _round_up(batch, 128))
    if _round_up(batch, 128) >= 256:
        tile = min(tile, _round_up(pl.cdiv(batch, 2), 128))
    n_tiles = pl.cdiv(batch, tile)
    if n_tiles > 1 and n_tiles % 2 == 1:   # best-effort even step count
        tile = _round_up(pl.cdiv(batch, n_tiles + 1), 128)
        n_tiles = pl.cdiv(batch, tile)
    return tile, n_tiles


@functools.partial(jax.jit, static_argnames=("max_tile_b", "epilogue_dtype"))
def baseline_net(x, w1, b1, w2, b2, *, max_tile_b=4096,
                 epilogue_dtype=jnp.float32):
    """BaselineNet forward for a whole batch/rollout in one pallas_call.

    x  : (B, n_inputs)        f32 (debug/exact), or bf16 for the production
                              path (halves the only B-scaled HBM stream; the
                              MXU still accumulates in f32)
    w1 : (N_HIDDEN, n_inputs) PyTorch fc1.weight layout
    b1 : (N_HIDDEN,)
    w2 : (1, N_HIDDEN)        PyTorch fc2.weight layout
    b2 : (1,)
    max_tile_b     : batch tile cap (multiple of 128); 4096 is safe on every
                     generation, long rollouts can use 8192 on v6e/v7x.
    epilogue_dtype : jnp.float32 (default, v5e-safe) or jnp.bfloat16 on
                     v6e/v7x; the fc2 reduction always accumulates in f32.
    returns (B, 1) f32
    """
    B, n_in = x.shape
    tile_b, n_tiles = _pick_tile(B, max_tile_b)

    # Tiny, loop-invariant operands; x itself is fed untouched.
    # TODO(synk): for long rollouts, store the rollout observation buffer as
    # bf16 upstream so the production path never touches f32 x at all.
    w1_c = w1.astype(x.dtype)                               # (64, n_in)
    b1_c = b1.reshape(N_HIDDEN, 1).astype(epilogue_dtype)   # (64, 1)
    w2_c = w2.reshape(N_HIDDEN, 1).astype(epilogue_dtype)   # (64, 1)
    b2_c = b2.reshape(1, 1).astype(jnp.float32)             # (1, 1) -> SMEM

    cost = pl.CostEstimate(
        flops=2 * N_HIDDEN * n_in * B + 4 * N_HIDDEN * B,
        transcendentals=0,
        bytes_accessed=(x.size * x.dtype.itemsize + 4 * B
                        + w1_c.size * w1_c.dtype.itemsize
                        + (b1_c.size + w2_c.size)
                        * jnp.dtype(epilogue_dtype).itemsize + 4))

    out = pl.pallas_call(
        _baseline_kernel,
        out_shape=jax.ShapeDtypeStruct((1, B), jnp.float32),
        grid=(n_tiles,),
        in_specs=[
            pl.BlockSpec((tile_b, n_in), lambda i: (i, 0)),      # x (pipelined)
            pl.BlockSpec((N_HIDDEN, n_in), lambda i: (0, 0)),    # w1 resident
            pl.BlockSpec((N_HIDDEN, 1), lambda i: (0, 0)),       # b1 resident
            pl.BlockSpec((N_HIDDEN, 1), lambda i: (0, 0)),       # w2 resident
            pl.BlockSpec(memory_space=pltpu.MemorySpace.SMEM),   # b2 scalar
        ],
        out_specs=pl.BlockSpec((1, tile_b), lambda i: (0, i)),   # lane-dense
        compiler_params=pltpu.CompilerParams(
            dimension_semantics=("parallel",)),
        cost_estimate=cost,
    )(x, w1_c, b1_c, w2_c, b2_c)

    # (1, B) lane-dense slab -> (B, 1), matching the PyTorch forward.
    return out.reshape(B, 1)


def init_params(key, n_inputs):
    """Mirror BaselineNet.__init__ (PyTorch layouts): weights ~ Normal(0, 0.3);
    biases keep nn.Linear's default Uniform(-1/sqrt(fan_in), 1/sqrt(fan_in))."""
    k1, k2, k3, k4 = jax.random.split(key, 4)
    w1 = 0.3 * jax.random.normal(k1, (N_HIDDEN, n_inputs), dtype=jnp.float32)
    bound1 = 1.0 / (n_inputs ** 0.5)
    b1 = jax.random.uniform(k2, (N_HIDDEN,), jnp.float32, -bound1, bound1)
    w2 = 0.3 * jax.random.normal(k3, (1, N_HIDDEN), dtype=jnp.float32)
    bound2 = 1.0 / (N_HIDDEN ** 0.5)
    b2 = jax.random.uniform(k4, (1,), jnp.float32, -bound2, bound2)
    return w1, b1, w2, b2


if __name__ == "__main__":
    key = jax.random.PRNGKey(0)
    kx, kp = jax.random.split(key)

    n_inputs = 32
    batch = 1000   # a whole rollout in ONE call; exercises the ragged tail tile

    x = jax.random.normal(kx, (batch, n_inputs), dtype=jnp.float32)
    w1, b1, w2, b2 = init_params(kp, n_inputs)

    # --- Production path: bf16 x stream, f32 MXU accumulate, f32 epilogue. ---
    x16 = x.astype(jnp.bfloat16)
    out = jax.block_until_ready(baseline_net(x16, w1, b1, w2, b2))
    assert out.shape == (batch, 1)

    x_r = x16.astype(jnp.float32)
    w1_r = w1.astype(jnp.bfloat16).astype(jnp.float32)
    h_ref = jnp.maximum(
        jnp.matmul(x_r, w1_r.T, precision=jax.lax.Precision.HIGHEST)
        + b1[None, :], 0.0)
    ref = jnp.matmul(h_ref, w2.T,
                     precision=jax.lax.Precision.HIGHEST) + b2[None, :]
    assert jnp.allclose(out, ref, atol=1e-3, rtol=1e-3), float(
        jnp.max(jnp.abs(out - ref)))

    # --- Debug/exact path: f32 x straight through (no wrapper cast).  Loose
    #     tolerance: default-precision f32 MXU passes may round like bf16. ---
    out_f32 = jax.block_until_ready(baseline_net(x, w1, b1, w2, b2))
    h32 = jnp.maximum(
        jnp.matmul(x, w1.T, precision=jax.lax.Precision.HIGHEST)
        + b1[None, :], 0.0)
    ref32 = jnp.matmul(h32, w2.T,
                       precision=jax.lax.Precision.HIGHEST) + b2[None, :]
    assert jnp.allclose(out_f32, ref32, atol=1e-1, rtol=5e-2), float(
        jnp.max(jnp.abs(out_f32 - ref32)))

    # --- v6e/v7x option: bf16 VPU epilogue (ReLU + w2 mul), f32 reduction. ---
    out_e = jax.block_until_ready(
        baseline_net(x16, w1, b1, w2, b2, epilogue_dtype=jnp.bfloat16))
    assert jnp.allclose(out_e, ref, atol=2e-1, rtol=5e-2), float(
        jnp.max(jnp.abs(out_e - ref)))

    print("KERNEL_OK")
</pallas_src>

<mosaic_0001>
module attributes {stable_mosaic.version = 11 : i64} {
  func.func @_baseline_kernel(%arg0: i32, %arg1: memref<512x32xbf16, #tpu.memory_space<vmem>>, %arg2: memref<64x32xbf16, #tpu.memory_space<vmem>>, %arg3: memref<64x1xf32, #tpu.memory_space<vmem>>, %arg4: memref<64x1xf32, #tpu.memory_space<vmem>>, %arg5: memref<1x1xf32, #tpu.memory_space<smem>>, %arg6: memref<1x512xf32, #tpu.memory_space<vmem>>) attributes {dimension_semantics = [#tpu.dimension_semantics<parallel>], iteration_bounds = array<i64: 2>, scalar_prefetch = 0 : i64, scratch_operands = 0 : i64, tpu.core_type = #tpu.core_type<tc>, window_params = [{transform_indices = @transform_0, window_bounds = array<i64: 512, 32>}, {pipeline_mode = #tpu.pipeline_mode<synchronous>, transform_indices = @transform_1, window_bounds = array<i64: 64, 32>}, {pipeline_mode = #tpu.pipeline_mode<synchronous>, transform_indices = @transform_2, window_bounds = array<i64: 64, 1>}, {pipeline_mode = #tpu.pipeline_mode<synchronous>, transform_indices = @transform_3, window_bounds = array<i64: 64, 1>}, {transform_indices = @transform_4, window_bounds = array<i64: 1, 1>}, {transform_indices = @transform_5, window_bounds = array<i64: 1, 512>}]} {
    %c0 = arith.constant 0 : index
    %c0_0 = arith.constant 0 : index
    %0 = vector.load %arg2[%c0, %c0_0] : memref<64x32xbf16, #tpu.memory_space<vmem>>, vector<64x32xbf16>
    %c0_1 = arith.constant 0 : index
    %c0_2 = arith.constant 0 : index
    %1 = vector.load %arg1[%c0_1, %c0_2] : memref<512x32xbf16, #tpu.memory_space<vmem>>, vector<512x32xbf16>
    %cst = arith.constant dense<0.000000e+00> : vector<64x512xf32>
    %2 = tpu.matmul %0, %1, %cst {dimension_numbers = #tpu.dot_dimension_numbers<[1], [1], [0], [0], [0, 0, 1, 0], [], []>} : vector<64x32xbf16>, vector<512x32xbf16>, vector<64x512xf32> -> vector<64x512xf32>
    %c0_3 = arith.constant 0 : index
    %c0_4 = arith.constant 0 : index
    %3 = vector.load %arg3[%c0_3, %c0_4] : memref<64x1xf32, #tpu.memory_space<vmem>>, vector<64x1xf32>
    %4 = vector.broadcast %3 : vector<64x1xf32> to vector<64x512xf32>
    %5 = arith.addf %2, %4 : vector<64x512xf32>
    %cst_5 = arith.constant 0.000000e+00 : f32
    %6 = vector.broadcast %cst_5 : f32 to vector<64x512xf32>
    %7 = arith.maximumf %5, %6 : vector<64x512xf32>
    %c0_6 = arith.constant 0 : index
    %c0_7 = arith.constant 0 : index
    %8 = vector.load %arg4[%c0_6, %c0_7] : memref<64x1xf32, #tpu.memory_space<vmem>>, vector<64x1xf32>
    %9 = vector.broadcast %8 : vector<64x1xf32> to vector<64x512xf32>
    %10 = arith.mulf %7, %9 : vector<64x512xf32>
    %cst_8 = arith.constant dense<0.000000e+00> : vector<512xf32>
    %11 = vector.multi_reduction <add>, %10, %cst_8 [0] : vector<64x512xf32> to vector<512xf32>
    %12 = vector.shape_cast %11 : vector<512xf32> to vector<1x512xf32>
    %c0_9 = arith.constant 0 : index
    %c0_10 = arith.constant 0 : index
    %13 = memref.load %arg5[%c0_9, %c0_10] : memref<1x1xf32, #tpu.memory_space<smem>>
    %14 = vector.broadcast %13 : f32 to vector<1x512xf32>
    %15 = arith.addf %12, %14 : vector<1x512xf32>
    %c0_11 = arith.constant 0 : index
    %c0_12 = arith.constant 0 : index
    %16 = vector.load %arg6[%c0_11, %c0_12] : memref<1x512xf32, #tpu.memory_space<vmem>>, vector<1x512xf32>
    tpu.vector_store %arg6[%c0_11, %c0_12], %15 {strides = array<i32>} : memref<1x512xf32, #tpu.memory_space<vmem>>, vector<1x512xf32>,
    return
  }
  func.func @transform_0(%arg0: i32) -> (i32, i32) {
    %c0_i32 = arith.constant 0 : i32
    %c0_i32_0 = arith.constant 0 : i32
    return %arg0, %c0_i32 : i32, i32
  }
  func.func @transform_1(%arg0: i32) -> (i32, i32) {
    %c0_i32 = arith.constant 0 : i32
    %c0_i32_0 = arith.constant 0 : i32
    %c0_i32_1 = arith.constant 0 : i32
    return %c0_i32, %c0_i32_0 : i32, i32
  }
  func.func @transform_2(%arg0: i32) -> (i32, i32) {
    %c0_i32 = arith.constant 0 : i32
    %c0_i32_0 = arith.constant 0 : i32
    %c0_i32_1 = arith.constant 0 : i32
    return %c0_i32, %c0_i32_0 : i32, i32
  }
  func.func @transform_3(%arg0: i32) -> (i32, i32) {
    %c0_i32 = arith.constant 0 : i32
    %c0_i32_0 = arith.constant 0 : i32
    %c0_i32_1 = arith.constant 0 : i32
    return %c0_i32, %c0_i32_0 : i32, i32
  }
  func.func @transform_4(%arg0: i32) -> (i32, i32) {
    %c0_i32 = arith.constant 0 : i32
    %c0_i32_0 = arith.constant 0 : i32
    %c0_i32_1 = arith.constant 0 : i32
    return %c0_i32, %c0_i32_0 : i32, i32
  }
  func.func @transform_5(%arg0: i32) -> (i32, i32) {
    %c0_i32 = arith.constant 0 : i32
    %c0_i32_0 = arith.constant 0 : i32
    return %c0_i32, %arg0 : i32, i32
  }
}

</mosaic_0001>

<bundles_post_ra>
// kernel: baseline_net.1
= control target key start
LH: loop header
LB: loop body
LE: loop exit
PB: predicated region body
PF: predicated region fallthrough
CT: control target
= control target key end

     0   :  { %s1637_s0 = inlined_call_operand.vmem [shape: bf16[1000,32], index: 0, kind: input, shape index: {}]   ;;  %s1638_s1 = inlined_call_operand.vmem [shape: bf16[64,32], index: 1, kind: input, shape index: {}]   ;;  %s1639_s2 = inlined_call_operand.vmem [shape: f32[64,1], index: 2, kind: input, shape index: {}]   ;;  %s1640_s3 = inlined_call_operand.vmem [shape: f32[64,1], index: 3, kind: input, shape index: {}]   ;;  %s1641_s4 = inlined_call_operand.<no memory space> [shape: f32[1,1], index: 4, kind: input, shape index: {}]   ;;  %s1642_s5 = inlined_call_operand.hbm [shape: f32[1,1000], index: 5, kind: output, shape index: {}]  }
   0x1   :  { %10 = sst [smem:[#allocation2]] %s1641_s4 }
   0x2   :  { %11 = vsyncpa [#allocation4], 0 }
   0x3   :  { %13 = vsyncpa [#allocation4 + $0x1], 0  ;;  %s1379_s20 = smov 0   ;;  %s1381_s21 = smov 0  }
   0x4   :  { %s1383_s22 = smov 0   ;;  %s1385_s23 = smov 0  }
   0x5 LB: > { %s1080_s4 = sadd.s32 4294967295, %s1341_s23   ;;  %s1081_s24 = sadd.s32 4294967294, %s1341_s23   ;;  %s1341_s23 = sphi %s1385_s23, %s1648_s23   ;;  %s1337_s22 = sphi %s1383_s22, %s1647_s22   ;;  %s1333_s21 = sphi %s1381_s21, %s1646_s21   ;;  %s1329_s20 = sphi %s1379_s20, %s1645_s20  }
   0x6   : > { %s1402_s25 = sadd.s32 1, %s1341_s23   ;;  %s136_s26 = sadd.s32 1, %s1337_s22 }
   0x7   : > { %s133_s27 = ssub.s32 %s1341_s23, %s1402_s25  ;;  %p146_p0 = scmp.ne.s32.totalorder %s1337_s22, %s1333_s21 }
   0x8   : > { %p134_p1 = scmp.eq.s32.totalorder %s133_s27, 0  ;;  %p147_p2 = scmp.eq.s32.totalorder %s1080_s4, 1 }
   0x9   : > { %p152_p3 = scmp.ne.s32.totalorder %s1333_s21, %s1329_s20  ;;  %p153_p4 = scmp.eq.s32.totalorder %s1081_s24, 1 }
   0xa   : > { %s1412_s28 = scalar_select %p134_p1, %s1337_s22, %s136_s26  }
   0xb   : > { %p1414_p5 = por %p147_p2, %p146_p0  ;;  %p1418_p6 = por %p153_p4, %p152_p3 }
   0xc   : > { %p1084_p7 = scmp.ge.s32.totalorder %s1341_s23, 1  ;;  %p200_p8 = scmp.lt.s32.totalorder %s1341_s23, 3 }
   0xe   : > { %p201_p9 = pnand %p1084_p7, %p200_p8 }
   0xf   : > { %s1424_s6 = sshll.u32 (!%p201_p9), %s1080_s4, 6  ;;  %s967_s19 = sld [smem:[#allocation2]] (!%p201_p9) }
  0x10   : > { %204 = sbr.rel (%p201_p9) target bundleno = 359 (0x167), region = 40  ;;  %p237_p10 = scmp.lt.s32.totalorder (!%p201_p9), %s1424_s6, 124 }
  0x11   : > { %s229_s4 = sand.u32 (!%p201_p9), 1, %s1333_s21   ;;  %s1345_s12 = smov (!%p201_p9), [#allocation3]  }
  0x12   : > { %s1085_s24 = sshll.u32 (!%p201_p9), %s229_s4, 2  ;;  %s1008_s10 = scalar_lea.sflag (!%p201_p9), [#allocation4], %s229_s4 }
  0x13   : > { %s231_s26 = scalar_lea.vmem (!%p201_p9), [#allocation3], %s1085_s24  ;;  %s1285_s13 = sshll.u32 (!%p201_p9), %s1345_s12, 4  ;;  %s1286_s13 = int_to_ptr.vmem [resolvable:$false] %s1285_s13 }
  0x14   : > { %s1022_s27 = sshll.u32 (!%p201_p9), %s231_s26, 4  ;;  %s1023_s27 = int_to_ptr.vmem [resolvable:$true] %s1022_s27 }
  0x15   : > { %v1430_v0 = vld [vmem:[%s1638_s1] sm:$0xff]   ;;  %vm548_vm0 = vcmask 261120   ;;  %s238_s9 = scalar_select %p237_p10, %s1424_s6, 124  ;;  %v1343_v1 = vmov 0   ;;  %v322_v3 = vld [vmem:[%s1639_s2 + $0x10] sm:$0xff]  ;;  %v321_v4 = vld [vmem:[%s1639_s2 + $0x8] sm:$0xff] }
  0x16   : > { %1154 = vmatprep.mubr.msk.bf16.mxu0 %vm548_vm0, %v1430_v0  ;;  %1178 = vmatprep.mubr.msk.bf16.mxu1 %vm548_vm0, %v1430_v0  ;;  %v320_v2 = vld [vmem:[%s1639_s2] sm:$0xff]  ;;  %v323_v5 = vld [vmem:[%s1639_s2 + $0x18] sm:$0xff]  ;;  %v836_v11 = vld [vmem:[%s1640_s3 + $0x8] sm:$0xff]  ;;  %s1281_s11 = scalar_lea.vmem %s1023_s27, 64  ;;  %p1288_p0 = scmp.lt.s32.totalorder %s1023_s27, %s1286_s13 }
  0x17   : > { %1243 = vset.pattern.permute.xlu0 %v1343_v1  ;;  %1244 = vset.pattern.permute.xlu1 %v1343_v1  ;;  %s1087_s14 = sshll.u32 %s238_s9, 2  ;;  %v835_v9 = vld [vmem:[%s1640_s3] sm:$0xff]  ;;  %v837_v19 = vld [vmem:[%s1640_s3 + $0x10] sm:$0xff]  ;;  %v325_v38 = vld [vmem:[%s1639_s2 + $0x28] sm:$0xff]  ;;  %s1020_s9 = scalar_lea.hbm %s1642_s5, %s1424_s6 }
  0x18   : > { %330 = vperm.xlu0 %1243, %v320_v2   ;;  %340 = vperm.xlu1 %1244, %v322_v3   ;;  %s1446_s17 = scalar_lea.vmem %s1637_s0, %s1087_s14  ;;  %v324_v18 = vld [vmem:[%s1639_s2 + $0x20] sm:$0xff]  ;;  %v838_v39 = vld [vmem:[%s1640_s3 + $0x18] sm:$0xff]  ;;  %v326_v42 = vld [vmem:[%s1639_s2 + $0x30] sm:$0xff]  ;;  %p1282_p11 = scmp.ne.s32.totalorder %s1023_s27, %s1281_s11 }
  0x19   : > { %v1245_v6 = vld [vmem:[%s1446_s17 + $0x78] sm:$0xff]   ;;  %v1249_v13 = vld [vmem:[%s1446_s17 + $0x70] sm:$0xff]   ;;  %v1253_v21 = vld [vmem:[%s1446_s17 + $0x68] sm:$0xff]   ;;  %s1287_s14 = scalar_lea.vmem %s1286_s13, 128 }
  0x1a   : > { %v1246_v7 = vld [vmem:[%s1446_s17 + $0xf8] sm:$0xff]   ;;  %1186 = vmatprep.subr.msk.bf16.mxu0 %vm548_vm0, %v1245_v6  ;;  %v1250_v15 = vld [vmem:[%s1446_s17 + $0xf0] sm:$0xff]   ;;  %v1254_v23 = vld [vmem:[%s1446_s17 + $0xe8] sm:$0xff]   ;;  %p1283_p12 = pnand %p1282_p11, %p1414_p5  ;;  %p1289_p1 = scmp.lt.s32.totalorder %s1287_s14, %s1281_s11 }
  0x1b   : > { %v1247_v8 = vld [vmem:[%s1446_s17 + $0x38] sm:$0xff]   ;;  %1194 = vmatprep.subr.msk.bf16.mxu1 %vm548_vm0, %v1246_v7  ;;  %v1251_v16 = vld [vmem:[%s1446_s17 + $0x30] sm:$0xff]   ;;  %v1255_v24 = vld [vmem:[%s1446_s17 + $0x28] sm:$0xff]  }
  0x1c   : > { %335 = vperm.xlu0 %1243, %v321_v4   ;;  %v1248_v10 = vld [vmem:[%s1446_s17 + $0xb8] sm:$0xff]   ;;  %345 = vperm.xlu1 %1244, %v323_v5   ;;  %v583_v12 = vsel %vm548_vm0, %v1247_v8, 0  ;;  %v1252_v17 = vld [vmem:[%s1446_s17 + $0xb0] sm:$0xff]   ;;  %v580_v20 = vsel %vm548_vm0, %v1251_v16, 0  ;;  %v1256_v25 = vld [vmem:[%s1446_s17 + $0xa8] sm:$0xff]   ;;  %v577_v26 = vsel %vm548_vm0, %v1255_v24, 0  ;;  %p1284_p13 = pneg %p1283_p12  ;;  %p1290_p2 = por %p1289_p1, %p1288_p0 }
  0x1d   : > { %1139 = vmatpush3.bf16.xpose.msra.mxu0 %v583_v12  ;;  %v631_v14 = vsel %vm548_vm0, %v1248_v10, 0  ;;  %v628_v22 = vsel %vm548_vm0, %v1252_v17, 0  ;;  %v1257_v27 = vld [vmem:[%s1446_s17 + $0x60] sm:$0xff]   ;;  %v625_v28 = vsel %vm548_vm0, %v1256_v25, 0  ;;  %v1261_v33 = vld [vmem:[%s1446_s17 + $0x58] sm:$0xff]   ;;  %v1265_v41 = vld [vmem:[%s1446_s17 + $0x50] sm:$0xff]  }
  0x1e   : > { %1163 = vmatpush3.bf16.xpose.msra.mxu1 %v631_v14  ;;  %1187 = vmatprep.subr.msk.bf16.mxu0 %vm548_vm0, %v1249_v13  ;;  %v1258_v29 = vld [vmem:[%s1446_s17 + $0xe0] sm:$0xff]   ;;  %v1262_v35 = vld [vmem:[%s1446_s17 + $0xd8] sm:$0xff]   ;;  %v1266_v44 = vld [vmem:[%s1446_s17 + $0xd0] sm:$0xff]   ;;  %p1291_p3 = pnand %p1290_p2, %p1284_p13 }
  0x1f   : > { %1195 = vmatprep.subr.msk.bf16.mxu1 %vm548_vm0, %v1250_v15  ;;  %v1259_v30 = vld [vmem:[%s1446_s17 + $0x20] sm:$0xff]   ;;  %v1263_v36 = vld [vmem:[%s1446_s17 + $0x18] sm:$0xff]   ;;  %v1267_v46 = vld [vmem:[%s1446_s17 + $0x10] sm:$0xff]  }
  0x20   : > { %845 = vperm.xlu0 %1243, %v835_v9   ;;  %850 = vperm.xlu1 %1244, %v836_v11   ;;  %v1260_v31 = vld [vmem:[%s1446_s17 + $0xa0] sm:$0xff]   ;;  %v574_v32 = vsel %vm548_vm0, %v1259_v30, 0  ;;  %v1264_v37 = vld [vmem:[%s1446_s17 + $0x98] sm:$0xff]   ;;  %v571_v40 = vsel %vm548_vm0, %v1263_v36, 0  ;;  %v1268_v48 = vld [vmem:[%s1446_s17 + $0x90] sm:$0xff]   ;;  %v568_v50 = vsel %vm548_vm0, %v1267_v46, 0 }
  0x21   : > { %v622_v34 = vsel %vm548_vm0, %v1260_v31, 0  ;;  %v619_v43 = vsel %vm548_vm0, %v1264_v37, 0  ;;  %v839_v45 = vld [vmem:[%s1640_s3 + $0x20] sm:$0xff]  ;;  %v327_v47 = vld [vmem:[%s1639_s2 + $0x38] sm:$0xff]  ;;  %v840_v49 = vld [vmem:[%s1640_s3 + $0x28] sm:$0xff]  ;;  %v616_v53 = vsel %vm548_vm0, %v1268_v48, 0 }
  0x22   : > { %v1269_v51 = vld [vmem:[%s1446_s17 + $0x48] sm:$0xff]   ;;  %v841_v52 = vld [vmem:[%s1640_s3 + $0x30] sm:$0xff]  ;;  %v842_v55 = vld [vmem:[%s1640_s3 + $0x38] sm:$0xff] }
  0x23   : > { %v1270_v54 = vld [vmem:[%s1446_s17 + $0xc8] sm:$0xff]   ;;  %v1273_v59 = vld [vmem:[%s1446_s17 + $0x40] sm:$0xff]   ;;  %v1279_v4 = vld [vmem:[%s1638_s1 + $0x10] sm:$0xff]  }
  0x24   : > { %350 = vperm.xlu0 %1243, %v324_v18   ;;  %855 = vperm.xlu1 %1244, %v837_v19   ;;  %v1271_v56 = vld [vmem:[%s1446_s17 + $0x8] sm:$0xff]   ;;  %v1274_v61 = vld [vmem:[%s1446_s17 + $0xc0] sm:$0xff]  }
  0x25   : > { %1141 = vmatpush3.bf16.xpose.msra.mxu0 %v580_v20  ;;  %v1272_v57 = vld [vmem:[%s1446_s17 + $0x88] sm:$0xff]   ;;  %v565_v58 = vsel %vm548_vm0, %v1271_v56, 0  ;;  %v1275_v62 = vld [vmem:[%s1446_s17] sm:$0xff]  }
  0x26   : > { %1165 = vmatpush3.bf16.xpose.msra.mxu1 %v628_v22  ;;  %1188 = vmatprep.subr.msk.bf16.mxu0 %vm548_vm0, %v1253_v21  ;;  %v613_v60 = vsel %vm548_vm0, %v1272_v57, 0  ;;  %v1276_v63 = vld [vmem:[%s1446_s17 + $0x80] sm:$0xff]   ;;  %v562_v1 = vsel %vm548_vm0, %v1275_v62, 0  ;;  %v1278_v3 = vld [vmem:[%s1638_s1 + $0x8] sm:$0xff]  }
  0x27   : > { %1196 = vmatprep.subr.msk.bf16.mxu1 %vm548_vm0, %v1254_v23  ;;  %v610_v2 = vsel %vm548_vm0, %v1276_v63, 0 }
  0x28   : > { %355 = vperm.xlu0 %1243, %v325_v38   ;;  %860 = vperm.xlu1 %1244, %v838_v39  }
  0x2c   : > { %360 = vperm.xlu0 %1243, %v326_v42   ;;  %865 = vperm.xlu1 %1244, %v839_v45  }
  0x2d   : > { %1143 = vmatpush3.bf16.xpose.msra.mxu0 %v577_v26 }
  0x2e   : > { %1167 = vmatpush3.bf16.xpose.msra.mxu1 %v625_v28  ;;  %1189 = vmatprep.subr.msk.bf16.mxu0 %vm548_vm0, %v1257_v27 }
  0x2f   : > { %1197 = vmatprep.subr.msk.bf16.mxu1 %vm548_vm0, %v1258_v29 }
  0x30   : > { %365 = vperm.xlu0 %1243, %v327_v47   ;;  %870 = vperm.xlu1 %1244, %v840_v49  }
  0x34   : > { %875 = vperm.xlu0 %1243, %v841_v52   ;;  %880 = vperm.xlu1 %1244, %v842_v55  }
  0x35   : > { %1145 = vmatpush3.bf16.xpose.msra.mxu0 %v574_v32 }
  0x36   : > { %1169 = vmatpush3.bf16.xpose.msra.mxu1 %v622_v34  ;;  %1190 = vmatprep.subr.msk.bf16.mxu0 %vm548_vm0, %v1261_v33 }
  0x37   : > { %1198 = vmatprep.subr.msk.bf16.mxu1 %vm548_vm0, %v1262_v35 }
  0x3d   : > { %1147 = vmatpush3.bf16.xpose.msra.mxu0 %v571_v40 }
  0x3e   : > { %1171 = vmatpush3.bf16.xpose.msra.mxu1 %v619_v43  ;;  %1191 = vmatprep.subr.msk.bf16.mxu0 %vm548_vm0, %v1265_v41 }
  0x3f   : > { %1199 = vmatprep.subr.msk.bf16.mxu1 %vm548_vm0, %v1266_v44 }
  0x45   : > { %1149 = vmatpush3.bf16.xpose.msra.mxu0 %v568_v50 }
  0x46   : > { %1173 = vmatpush3.bf16.xpose.msra.mxu1 %v616_v53  ;;  %1192 = vmatprep.subr.msk.bf16.mxu0 %vm548_vm0, %v1269_v51 }
  0x47   : > { %1200 = vmatprep.subr.msk.bf16.mxu1 %vm548_vm0, %v1270_v54 }
  0x4d   : > { %1151 = vmatpush3.bf16.xpose.msra.mxu0 %v565_v58 }
  0x4e   : > { %1175 = vmatpush3.bf16.xpose.msra.mxu1 %v613_v60  ;;  %1193 = vmatprep.subr.msk.bf16.mxu0 %vm548_vm0, %v1273_v59 }
  0x4f   : > { %1201 = vmatprep.subr.msk.bf16.mxu1 %vm548_vm0, %v1274_v61 }
  0x55   : > { %1153 = vmatpush3.bf16.xpose.msra.mxu0 %v562_v1 }
  0x56   : > { %1177 = vmatpush3.bf16.xpose.msra.mxu1 %v610_v2 }
  0x5c   : > { %1155 = vmatmul.mubr.msk.bf16.vlgmr.msra.gmra.mxu0 %vm548_vm0, %v1430_v0 }
  0x5d   : > { %1179 = vmatmul.mubr.msk.bf16.vlgmr.msra.gmra.mxu1 %vm548_vm0, %v1430_v0  ;;  %1156 = vmatprep.mubr.msk.bf16.mxu0 %vm548_vm0, %v1278_v3  ;;  %v1280_v0 = vld [vmem:[%s1638_s1 + $0x18] sm:$0xff]  }
  0x5e   : > { %1180 = vmatprep.mubr.msk.bf16.mxu1 %vm548_vm0, %v1278_v3 }
  0x64   : > { %1157 = vmatmul.mubr.msk.bf16.gmra.mxu0 %vm548_vm0, %v1278_v3 }
  0x65   : > { %1181 = vmatmul.mubr.msk.bf16.gmra.mxu1 %vm548_vm0, %v1278_v3  ;;  %1158 = vmatprep.mubr.msk.bf16.mxu0 %vm548_vm0, %v1279_v4 }
  0x66   : > { %1182 = vmatprep.mubr.msk.bf16.mxu1 %vm548_vm0, %v1279_v4 }
  0x6c   : > { %1159 = vmatmul.mubr.msk.bf16.gmra.mxu0 %vm548_vm0, %v1279_v4 }
  0x6d   : > { %1183 = vmatmul.mubr.msk.bf16.gmra.mxu1 %vm548_vm0, %v1279_v4  ;;  %1160 = vmatprep.mubr.msk.bf16.mxu0 %vm548_vm0, %v1280_v0 }
  0x6e   : > { %1184 = vmatprep.mubr.msk.bf16.mxu1 %vm548_vm0, %v1280_v0 }
  0x74   : > { %1161 = vmatmul.mubr.msk.bf16.gmra.mxu0 %vm548_vm0, %v1280_v0 }
  0x75   : > { %1185 = vmatmul.mubr.msk.bf16.gmra.mxu1 %vm548_vm0, %v1280_v0 }
  0x93   : > { %v331_v5 = vpop.permute.xlu0 %330  ;;  %v341_v6 = vpop.permute.xlu1 %340 }
  0x97   : > { %v336_v7 = vpop.permute.xlu0 %335  ;;  %v1579_v8 = vpop.permute.xlu1 %345 }
  0x9b   : > { %v846_v9 = vpop.permute.xlu0 %845  ;;  %v851_v12 = vpop.permute.xlu1 %850 }
  0x9f   : > { %v1581_v18 = vpop.permute.xlu0 %350  ;;  %v856_v31 = vpop.permute.xlu1 %855 }
  0xa3   : > { %v1583_v39 = vpop.permute.xlu0 %355  ;;  %v861_v60 = vpop.permute.xlu1 %860 }
 0x11c   : > { %v691_v10 = vpop.f32.mrf.mxu0 }
 0x11d   : > { %v764_v11 = vpop.f32.mrf.mxu1  ;;  %v692_v13 = vadd.f32 %v691_v10, %v331_v5 }
 0x11e   : > { %v765_v14 = vadd.f32 %v764_v11, %v331_v5  ;;  %v693_v15 = vpop.f32.mrf.mxu0 }
 0x11f   : > { %v694_v16 = vadd.f32 %v693_v15, %v331_v5  ;;  %v766_v17 = vpop.f32.mrf.mxu1  ;;  %v803_v23 = vmax.f32 %v692_v13, 0.0 }
 0x120   : > { %v767_v19 = vadd.f32 %v766_v17, %v331_v5  ;;  %v695_v20 = vpop.f32.mrf.mxu0  ;;  %v805_v24 = vmax.f32 %v765_v14, 0.0 }
 0x121   : > { %v696_v21 = vadd.f32 %v695_v20, %v336_v7  ;;  %v768_v22 = vpop.f32.mrf.mxu1  ;;  %v804_v27 = vmax.f32 %v694_v16, 0.0  ;;  %v883_v40 = vmul.f32 %v846_v9, %v803_v23 }
 0x122   : > { %v769_v25 = vadd.f32 %v768_v22, %v336_v7  ;;  %v697_v26 = vpop.f32.mrf.mxu0  ;;  %v806_v32 = vmax.f32 %v767_v19, 0.0  ;;  %v885_v41 = vmul.f32 %v846_v9, %v805_v24 }
 0x123   : > { %v807_v28 = vmax.f32 %v696_v21, 0.0  ;;  %v698_v29 = vadd.f32 %v697_v26, %v336_v7  ;;  %v770_v30 = vpop.f32.mrf.mxu1  ;;  %v884_v45 = vmul.f32 %v846_v9, %v804_v27 }
 0x124   : > { %v809_v33 = vmax.f32 %v769_v25, 0.0  ;;  %v771_v34 = vadd.f32 %v770_v30, %v336_v7  ;;  %v701_v35 = vpop.f32.mrf.mxu0  ;;  %v886_v50 = vmul.f32 %v846_v9, %v806_v32  ;;  %v1588_v7 = vpop.permute.xlu0 %360 }
 0x125   : > { %v808_v36 = vmax.f32 %v698_v29, 0.0  ;;  %v702_v37 = vadd.f32 %v701_v35, %v341_v6  ;;  %v774_v38 = vpop.f32.mrf.mxu1  ;;  %v887_v46 = vmul.f32 %v851_v12, %v807_v28 }
 0x126   : > { %v810_v42 = vmax.f32 %v771_v34, 0.0  ;;  %v775_v43 = vadd.f32 %v774_v38, %v341_v6  ;;  %v703_v44 = vpop.f32.mrf.mxu0  ;;  %v889_v51 = vmul.f32 %v851_v12, %v809_v33 }
 0x127   : > { %v811_v47 = vmax.f32 %v702_v37, 0.0  ;;  %v704_v48 = vadd.f32 %v703_v44, %v341_v6  ;;  %v776_v49 = vpop.f32.mrf.mxu1  ;;  %v888_v55 = vmul.f32 %v851_v12, %v808_v36  ;;  %v915_v3 = vadd.f32 %v887_v46, %v883_v40 }
 0x128   : > { %v813_v52 = vmax.f32 %v775_v43, 0.0  ;;  %v777_v53 = vadd.f32 %v776_v49, %v341_v6  ;;  %v705_v54 = vpop.f32.mrf.mxu0  ;;  %v890_v56 = vmul.f32 %v851_v12, %v810_v42  ;;  %v941_v9 = vadd.f32 %v889_v51, %v885_v41  ;;  %v366_v41 = vpop.permute.xlu0 %365 }
 0x129   : > { %v812_v57 = vmax.f32 %v704_v48, 0.0  ;;  %v706_v58 = vadd.f32 %v705_v54, %v1579_v8  ;;  %v778_v59 = vpop.f32.mrf.mxu1  ;;  %v891_v61 = vmul.f32 %v856_v31, %v811_v47  ;;  %v928_v14 = vadd.f32 %v888_v55, %v884_v45 }
 0x12a   : > { %v893_v62 = vmul.f32 %v856_v31, %v813_v52  ;;  %v814_v63 = vmax.f32 %v777_v53, 0.0  ;;  %v779_v1 = vadd.f32 %v778_v59, %v1579_v8  ;;  %v707_v2 = vpop.f32.mrf.mxu0  ;;  %v954_v15 = vadd.f32 %v890_v56, %v886_v50 }
 0x12b   : > { %v892_v4 = vmul.f32 %v856_v31, %v812_v57  ;;  %v815_v0 = vmax.f32 %v706_v58, 0.0  ;;  %v708_v5 = vadd.f32 %v707_v2, %v1579_v8  ;;  %v780_v6 = vpop.f32.mrf.mxu1  ;;  %v916_v20 = vadd.f32 %v915_v3, %v891_v61 }
 0x12c   : > { %v894_v10 = vmul.f32 %v856_v31, %v814_v63  ;;  %v817_v11 = vmax.f32 %v779_v1, 0.0  ;;  %v781_v12 = vadd.f32 %v780_v6, %v1579_v8  ;;  %v711_v13 = vpop.f32.mrf.mxu0  ;;  %v942_v21 = vadd.f32 %v941_v9, %v893_v62  ;;  %v866_v8 = vpop.permute.xlu1 %865 }
 0x12d   : > { %v816_v16 = vmax.f32 %v708_v5, 0.0  ;;  %v712_v17 = vadd.f32 %v711_v13, %v1581_v18  ;;  %v784_v19 = vpop.f32.mrf.mxu1  ;;  %v929_v25 = vadd.f32 %v928_v14, %v892_v4  ;;  %v895_v26 = vmul.f32 %v861_v60, %v815_v0  ;;  %v876_v9 = vpop.permute.xlu0 %875 }
 0x12e   : > { %v818_v22 = vmax.f32 %v781_v12, 0.0  ;;  %v785_v23 = vadd.f32 %v784_v19, %v1581_v18  ;;  %v713_v24 = vpop.f32.mrf.mxu0  ;;  %v955_v30 = vadd.f32 %v954_v15, %v894_v10  ;;  %v897_v31 = vmul.f32 %v861_v60, %v817_v11 }
 0x12f   : > { %v819_v27 = vmax.f32 %v712_v17, 0.0  ;;  %v714_v28 = vadd.f32 %v713_v24, %v1581_v18  ;;  %v786_v29 = vpop.f32.mrf.mxu1  ;;  %v896_v35 = vmul.f32 %v861_v60, %v816_v16  ;;  %v917_v47 = vadd.f32 %v916_v20, %v895_v26 }
 0x130   : > { %v821_v32 = vmax.f32 %v785_v23, 0.0  ;;  %v787_v33 = vadd.f32 %v786_v29, %v1581_v18  ;;  %v715_v34 = vpop.f32.mrf.mxu0  ;;  %v898_v36 = vmul.f32 %v861_v60, %v818_v22  ;;  %v943_v51 = vadd.f32 %v942_v21, %v897_v31  ;;  %v871_v61 = vpop.permute.xlu1 %870 }
 0x131   : > { %v820_v37 = vmax.f32 %v714_v28, 0.0  ;;  %v716_v38 = vadd.f32 %v715_v34, %v1583_v39  ;;  %v788_v40 = vpop.f32.mrf.mxu1  ;;  %v899_v42 = vmul.f32 %v866_v8, %v819_v27  ;;  %v930_v56 = vadd.f32 %v929_v25, %v896_v35 }
 0x132   : > { %v901_v43 = vmul.f32 %v866_v8, %v821_v32  ;;  %v822_v44 = vmax.f32 %v787_v33, 0.0  ;;  %v789_v45 = vadd.f32 %v788_v40, %v1583_v39  ;;  %v717_v46 = vpop.f32.mrf.mxu0  ;;  %v956_v57 = vadd.f32 %v955_v30, %v898_v36 }
 0x133   : > { %v900_v48 = vmul.f32 %v866_v8, %v820_v37  ;;  %v823_v49 = vmax.f32 %v716_v38, 0.0  ;;  %v718_v50 = vadd.f32 %v717_v46, %v1583_v39  ;;  %v790_v18 = vpop.f32.mrf.mxu1  ;;  %v918_v62 = vadd.f32 %v917_v47, %v899_v42 }
 0x134   : > { %v902_v52 = vmul.f32 %v866_v8, %v822_v44  ;;  %v825_v53 = vmax.f32 %v789_v45, 0.0  ;;  %v791_v54 = vadd.f32 %v790_v18, %v1583_v39  ;;  %v721_v55 = vpop.f32.mrf.mxu0  ;;  %v944_v63 = vadd.f32 %v943_v51, %v901_v43  ;;  %v881_v30 = vpop.permute.xlu1 %880 }
 0x135   : > { %v824_v58 = vmax.f32 %v718_v50, 0.0  ;;  %v722_v59 = vadd.f32 %v721_v55, %v1588_v7  ;;  %v794_v60 = vpop.f32.mrf.mxu1  ;;  %v931_v4 = vadd.f32 %v930_v56, %v900_v48  ;;  %v903_v0 = vmul.f32 %v871_v61, %v823_v49 }
 0x136   : > { %v826_v1 = vmax.f32 %v791_v54, 0.0  ;;  %v795_v2 = vadd.f32 %v794_v60, %v1588_v7  ;;  %v723_v3 = vpop.f32.mrf.mxu0  ;;  %v957_v10 = vadd.f32 %v956_v57, %v902_v52  ;;  %v905_v11 = vmul.f32 %v871_v61, %v825_v53 }
 0x137   : > { %v827_v5 = vmax.f32 %v722_v59, 0.0  ;;  %v724_v6 = vadd.f32 %v723_v3, %v1588_v7  ;;  %v796_v39 = vpop.f32.mrf.mxu1  ;;  %v904_v15 = vmul.f32 %v871_v61, %v824_v58  ;;  %v919_v26 = vadd.f32 %v918_v62, %v903_v0 }
 0x138   : > { %v829_v12 = vmax.f32 %v795_v2, 0.0  ;;  %v797_v13 = vadd.f32 %v796_v39, %v1588_v7  ;;  %v725_v14 = vpop.f32.mrf.mxu0  ;;  %v906_v21 = vmul.f32 %v871_v61, %v826_v1  ;;  %v945_v31 = vadd.f32 %v944_v63, %v905_v11 }
 0x139   : > { %v907_v16 = vmul.f32 %v876_v9, %v827_v5  ;;  %v828_v17 = vmax.f32 %v724_v6, 0.0  ;;  %v726_v19 = vadd.f32 %v725_v14, %v366_v41  ;;  %v798_v20 = vpop.f32.mrf.mxu1  ;;  %v932_v34 = vadd.f32 %v931_v4, %v904_v15 }
 0x13a   : > { %v909_v22 = vmul.f32 %v876_v9, %v829_v12  ;;  %v830_v23 = vmax.f32 %v797_v13, 0.0  ;;  %v799_v24 = vadd.f32 %v798_v20, %v366_v41  ;;  %v727_v25 = vpop.f32.mrf.mxu0  ;;  %v958_v38 = vadd.f32 %v957_v10, %v906_v21 }
 0x13b   : > { %v908_v27 = vmul.f32 %v876_v9, %v828_v17  ;;  %v831_v28 = vmax.f32 %v726_v19, 0.0  ;;  %v728_v29 = vadd.f32 %v727_v25, %v366_v41  ;;  %v800_v8 = vpop.f32.mrf.mxu1  ;;  %v920_v35 = vadd.f32 %v919_v26, %v907_v16 }
 0x13c   : > { %v910_v32 = vmul.f32 %v876_v9, %v830_v23  ;;  %v833_v7 = vmax.f32 %v799_v24, 0.0  ;;  %v801_v33 = vadd.f32 %v800_v8, %v366_v41  ;;  %v946_v40 = vadd.f32 %v945_v31, %v909_v22 }
 0x13d   : > { %v911_v36 = vmul.f32 %v881_v30, %v831_v28  ;;  %v832_v37 = vmax.f32 %v728_v29, 0.0  ;;  %v933_v44 = vadd.f32 %v932_v34, %v908_v27  ;;  %v1344_v62 = vmov 1966171168  }
 0x13e   : > { %v913_v42 = vmul.f32 %v881_v30, %v833_v7  ;;  %v834_v43 = vmax.f32 %v801_v33, 0.0  ;;  %v959_v47 = vadd.f32 %v958_v38, %v910_v32  ;;  %v980_v63 = vunpack.c.l.s4 %v1344_v62 }
 0x13f   : > { %v921_v45 = vadd.f32 %v920_v35, %v911_v36  ;;  %v912_v46 = vmul.f32 %v881_v30, %v832_v37  ;;  %v982_v1 = vlaneseq  ;;  %v968_v12 = vstv %s967_s19 }
 0x140   : > { %v947_v48 = vadd.f32 %v946_v40, %v913_v42  ;;  %v914_v49 = vmul.f32 %v881_v30, %v834_v43  ;;  %v981_v10 = vunpack.c.0.s8 %v980_v63 }
 0x141   : > { %v922_v50 = vrot.slane %v921_v45, 4  ;;  %v934_v18 = vadd.f32 %v933_v44, %v912_v46  ;;  %v983_v11 = vshrl.u32 %v982_v1, 7  ;;  %vm1004_vm1 = vcmp.lt.s32.totalorder %v982_v1, 512 }
 0x142   : > { %v948_v51 = vrot.slane %v947_v48, 4  ;;  %v960_v52 = vadd.f32 %v959_v47, %v914_v49 }
 0x143   : > { %v923_v53 = vadd.f32 %v922_v50, %v921_v45  ;;  %v935_v41 = vrot.slane %v934_v18, 4  ;;  %v984_v20 = vsub.s32 %v981_v10, %v983_v11 }
 0x144   : > { %v949_v54 = vadd.f32 %v948_v51, %v947_v48  ;;  %v961_v55 = vrot.slane %v960_v52, 4 }
 0x145   : > { %v924_v56 = vrot.slane %v923_v53, 2  ;;  %v936_v57 = vadd.f32 %v935_v41, %v934_v18 }
 0x146   : > { %v950_v58 = vrot.slane %v949_v54, 2  ;;  %v962_v59 = vadd.f32 %v961_v55, %v960_v52 }
 0x147   : > { %v925_v60 = vadd.f32 %v924_v56, %v923_v53  ;;  %v937_v61 = vrot.slane %v936_v57, 2 }
 0x148   : > { %v951_v2 = vadd.f32 %v950_v58, %v949_v54  ;;  %v963_v3 = vrot.slane %v962_v59, 2 }
 0x149   : > { %v926_v4 = vrot.slane %v925_v60, 1  ;;  %v938_v0 = vadd.f32 %v937_v61, %v936_v57 }
 0x14a   : > { %v952_v5 = vrot.slane %v951_v2, 1  ;;  %v964_v6 = vadd.f32 %v963_v3, %v962_v59 }
 0x14b   : > { %v927_v39 = vadd.f32 %v926_v4, %v925_v60  ;;  %v939_v9 = vrot.slane %v938_v0, 1 }
 0x14c   : > { %v953_v13 = vadd.f32 %v952_v5, %v951_v2  ;;  %v965_v14 = vrot.slane %v964_v6, 1 }
 0x14d   : > { %v940_v15 = vadd.f32 %v939_v9, %v938_v0  ;;  %v969_v17 = vadd.f32 %v968_v12, %v927_v39 }
 0x14e   : > { %v966_v16 = vadd.f32 %v965_v14, %v964_v6  ;;  %v971_v21 = vadd.f32 %v968_v12, %v953_v13 }
 0x14f   : > { %v970_v19 = vadd.f32 %v968_v12, %v940_v15 }
 0x150   : > { %v972_v22 = vadd.f32 %v968_v12, %v966_v16 }
 0x151   : > { %v977_v23 = vcombine.low %v969_v17, %v970_v19 }
 0x152   : > { %v978_v24 = vcombine.low %v971_v21, %v972_v22 }
 0x153   : > { %v985_v25 = vrot.slane %v977_v23, %v984_v20 }
 0x154   : > { %v992_v26 = vrot.slane %v978_v24, %v984_v20 }
 0x156   : > { %v993_v27 = vcombine.low %v985_v25, %v992_v26 }
 0x158   : > { %v1000_v28 = vrot.slane %v993_v27, %v984_v20 }
 0x15a   : > { %1006 = vst.msk [vmem:[%s231_s26] sm:$0xf] %vm1004_vm1, %v1000_v28 }
 0x15b   : > { %1294 = shalt.err (!%p1291_p3)
}
 0x15c   : > { %s1295_s17 = scalar_lea.hbm %s1020_s9, 64  ;;  %s1299_s16 = scalar_lea.hbm %s1642_s5, 128 }
 0x15d   : > { %p1296_p4 = scmp.ne.s32.totalorder %s1020_s9, %s1295_s17  ;;  %p1300_p9 = scmp.lt.s32.totalorder %s1020_s9, %s1642_s5 }
 0x15e   : > { %p1301_p10 = scmp.lt.s32.totalorder %s1299_s16, %s1295_s17 }
 0x15f   : > { %p1297_p7 = pnand %p1296_p4, %p1414_p5 }
 0x160   : > { %p1302_p11 = por %p1301_p10, %p1300_p9 }
 0x161   : > { %p1298_p8 = pneg %p1297_p7 }
 0x163   : > { %p1303_p12 = pnand %p1302_p11, %p1298_p8 }
 0x165   : > { %1306 = shalt.err (!%p1303_p12)
}
 0x166   : > { %1202 = dma.vmem_to_hbm [thread:$0]  (%p1414_p5), %s1023_s27, 64, %s1020_s9, %s1008_s10  }
 0x167 PF: > { %p1208_p13 = scmp.ge.s32.totalorder %s1341_s23, 2  ;;  %s1034_s4 = sand.u32 1, %s1329_s20  }
 0x168   : > { %s1035_s24 = scalar_lea.sflag [#allocation4], %s1034_s4 }
 0x169   : > { %p1205_p0 = pnand %p1208_p13, %p1418_p6 }
 0x16b   : > { %p1206_p1 = pneg %p1205_p0 }
 0x16d   : > { %1324 = dma.done.wait (%p1206_p1), %s1035_s24, 64  }
 0x16e   : > { %1326 = vsyncadd (%p1206_p1), %s1035_s24, 4294967232  ;;  %p16_p2 = scmp.ge.s32.totalorder %s1402_s25, 4   ;;  %s1645_s20 = smov %s1333_s21 }
 0x16f   : > { %s1646_s21 = smov %s1337_s22  ;;  %s1647_s22 = smov %s1412_s28 }
 0x170   : > { %s1648_s23 = smov %s1402_s25  ;;  %18 = sbr.rel (!%p16_p2) target bundleno = 5 (0x5), region = 75 }
 0x175   :  { %1040 = vsyncpa [#allocation4], 1 }
 0x176   :  { %1042 = vsyncpa [#allocation4 + $0x1], 1 }

</bundles_post_ra>
